<compile_context>
chip_gen: v7x
topology: tpu7x:2x2x1
jax: 0.10.0
libtpu: 0.0.40
codegen_flags: <defaults>
</compile_context>

<pallas_src>
import jax
import jax.numpy as jnp
from jax.experimental import pallas as pl
from jax.experimental.pallas import tpu as pltpu


def _round_up(x, m):
    return ((x + m - 1) // m) * m


def _pe2d_kernel(emb_ref, graph_ref, const_ref, out_ref):
    # emb_ref:   (TN, D)  input dtype
    # graph_ref: (TN, 2)  float32  (x = [:,0], y = [:,1])
    # const_ref: (3,  D)  float32  rows: [freq_x, freq_y, phase]
    # out_ref:   (TN, D)  input dtype
    g = graph_ref[...]
    const = const_ref[...]

    x = g[:, 0:1]            # (TN, 1)
    y = g[:, 1:2]            # (TN, 1)
    freq_x = const[0:1, :]   # (1, D)
    freq_y = const[1:2, :]   # (1, D)
    phase = const[2:3, :]    # (1, D)

    # angle broadcasts to (TN, D) in f32; one sin covers both sin/cos lanes via phase.
    angle = x * freq_x + y * freq_y + phase
    pe = jnp.sin(angle)

    # Add in the I/O dtype: keeps the add 2-packed for bf16 on v6e/v7x and avoids the
    # f32 upcast of the embedding tile; identical to the f32 path when I/O is f32.
    out_ref[...] = emb_ref[...] + pe.astype(out_ref.dtype)


def positional_encoding_2d(embeddings, graph, div_term, *, tn=None):
    """embeddings: [B, N, D] (any float dtype), graph: [B, N, 2], div_term: [D//2] f32."""
    B, N, D = embeddings.shape
    half = D // 2
    assert D % 2 == 0 and div_term.shape == (half,)

    rows = B * N
    emb2 = embeddings.reshape(rows, D)
    graph2 = graph.reshape(rows, 2).astype(jnp.float32)

    # Constant (3, D) block, resident across the whole grid: [freq_x, freq_y, phase].
    div = div_term.astype(jnp.float32)
    zeros = jnp.zeros((half,), jnp.float32)
    freq_x = jnp.concatenate([div, zeros])                       # first half uses x
    freq_y = jnp.concatenate([zeros, div])                       # second half uses y
    j = jnp.arange(half)
    phase_half = jnp.where(j % 2 == 1, jnp.pi / 2.0, 0.0).astype(jnp.float32)
    phase = jnp.concatenate([phase_half, phase_half])            # cos -> sin(.+pi/2)
    const = jnp.stack([freq_x, freq_y, phase])                   # (3, D) f32

    # ---- Row-tile selection -------------------------------------------------
    itemsize = jnp.dtype(embeddings.dtype).itemsize
    per_row_bytes = D * itemsize + D * itemsize + 2 * 4          # emb-in + out + graph
    vmem_budget = 16 << 20                                       # double-buffered tiles
    tn_cap = max(8, (vmem_budget // (2 * per_row_bytes)) // 8 * 8)
    # Keep at least ~4 grid steps so the "parallel" axis can shard across both
    # v7x TensorCores; costs nothing on single-TC v5e/v6e.
    tn_occ = max(8, _round_up(-(-rows // 4), 8))
    tn_req = tn if tn is not None else 8192
    tn = max(8, min(tn_req, tn_cap, tn_occ, _round_up(rows, 8)))

    grid = (pl.cdiv(rows, tn),)

    # Scoped-VMEM limit from actual usage + margin (never the full physical VMEM).
    vmem_usage = 2 * tn * per_row_bytes + 2 * (3 * D * 4)
    vmem_limit = int(vmem_usage + (8 << 20))

    out2 = pl.pallas_call(
        _pe2d_kernel,
        out_shape=jax.ShapeDtypeStruct((rows, D), embeddings.dtype),
        grid_spec=pltpu.PrefetchScalarGridSpec(
            num_scalar_prefetch=0,
            grid=grid,
            in_specs=[
                pl.BlockSpec((tn, D), lambda r: (r, 0)),
                pl.BlockSpec((tn, 2), lambda r: (r, 0)),
                pl.BlockSpec((3, D), lambda r: (0, 0)),
            ],
            out_specs=pl.BlockSpec((tn, D), lambda r: (r, 0)),
        ),
        input_output_aliases={0: 0},   # out = emb + pe, same shape/dtype as emb
        compiler_params=pltpu.CompilerParams(
            dimension_semantics=("parallel",),
            vmem_limit_bytes=vmem_limit,
        ),
    )(emb2, graph2, const)

    return out2.reshape(B, N, D)


def _reference(embeddings, graph, div_term):
    # Pure-JAX reference mirroring the PyTorch forward.
    D = embeddings.shape[-1]
    half = D // 2
    xs = graph[:, :, 0]
    ys = graph[:, :, 1]
    a_term = xs[..., None] * div_term  # [B, N, half]
    b_term = ys[..., None] * div_term
    j = jnp.arange(half)
    even = (j % 2 == 0)
    pe_x = jnp.where(even, jnp.sin(a_term), jnp.cos(a_term))
    pe_y = jnp.where(even, jnp.sin(b_term), jnp.cos(b_term))
    pe = jnp.concatenate([pe_x, pe_y], axis=-1)
    return embeddings + pe


if __name__ == "__main__":
    # Module hyperparameters (docstring implies embedding dim 128).
    d_model = 128
    T = 10000.0
    half = d_model // 2

    # Deterministic buffer init (matches the PyTorch __init__ formula).
    div_term = (1.0 / jnp.power(
        jnp.float32(T),
        2.0 * jnp.arange(half, dtype=jnp.float32) / jnp.float32(d_model * 2),
    )).astype(jnp.float32)

    # Small deterministic inputs.
    B, N = 2, 16
    key = jax.random.PRNGKey(0)
    k1, k2 = jax.random.split(key)
    embeddings = jax.random.normal(k1, (B, N, d_model), dtype=jnp.float32)
    graph = jax.random.uniform(k2, (B, N, 2), dtype=jnp.float32) * 10.0

    ref = _reference(embeddings, graph, div_term)

    out = positional_encoding_2d(embeddings, graph, div_term)
    out = jax.block_until_ready(out)

    assert out.shape == (B, N, d_model)
    assert out.dtype == embeddings.dtype
    assert jnp.allclose(out, ref, atol=1e-5, rtol=1e-5), "mismatch vs reference"

    # bf16 I/O path smoke test (dtype preserved, looser tolerance).
    out_bf16 = positional_encoding_2d(
        embeddings.astype(jnp.bfloat16), graph, div_term)
    out_bf16 = jax.block_until_ready(out_bf16)
    assert out_bf16.dtype == jnp.bfloat16
    assert jnp.allclose(out_bf16.astype(jnp.float32), ref, atol=3e-2, rtol=3e-2)

    print("KERNEL_OK")
</pallas_src>

<mosaic_0001>
module attributes {stable_mosaic.version = 11 : i64} {
  func.func @_pe2d_kernel(%arg0: i32, %arg1: memref<8x128xf32, #tpu.memory_space<vmem>>, %arg2: memref<8x2xf32, #tpu.memory_space<vmem>>, %arg3: memref<3x128xf32, #tpu.memory_space<vmem>>, %arg4: memref<8x128xf32, #tpu.memory_space<vmem>>) attributes {dimension_semantics = [#tpu.dimension_semantics<parallel>], iteration_bounds = array<i64: 4>, scalar_prefetch = 0 : i64, scratch_operands = 0 : i64, tpu.core_type = #tpu.core_type<tc>, window_params = [{transform_indices = @transform_0, window_bounds = array<i64: 8, 128>}, {transform_indices = @transform_1, window_bounds = array<i64: 8, 2>}, {pipeline_mode = #tpu.pipeline_mode<synchronous>, transform_indices = @transform_2, window_bounds = array<i64: 3, 128>}, {transform_indices = @transform_3, window_bounds = array<i64: 8, 128>}]} {
    %c0 = arith.constant 0 : index
    %c0_0 = arith.constant 0 : index
    %0 = vector.load %arg2[%c0, %c0_0] : memref<8x2xf32, #tpu.memory_space<vmem>>, vector<8x2xf32>
    %c0_1 = arith.constant 0 : index
    %c0_2 = arith.constant 0 : index
    %1 = vector.load %arg3[%c0_1, %c0_2] : memref<3x128xf32, #tpu.memory_space<vmem>>, vector<3x128xf32>
    %2 = vector.extract_strided_slice %0 {offsets = [0, 0], sizes = [8, 1], strides = [1, 1]} : vector<8x2xf32> to vector<8x1xf32>
    %3 = vector.extract_strided_slice %0 {offsets = [0, 1], sizes = [8, 1], strides = [1, 1]} : vector<8x2xf32> to vector<8x1xf32>
    %4 = vector.extract_strided_slice %1 {offsets = [0, 0], sizes = [1, 128], strides = [1, 1]} : vector<3x128xf32> to vector<1x128xf32>
    %5 = vector.extract_strided_slice %1 {offsets = [1, 0], sizes = [1, 128], strides = [1, 1]} : vector<3x128xf32> to vector<1x128xf32>
    %6 = vector.extract_strided_slice %1 {offsets = [2, 0], sizes = [1, 128], strides = [1, 1]} : vector<3x128xf32> to vector<1x128xf32>
    %7 = vector.broadcast %2 : vector<8x1xf32> to vector<8x128xf32>
    %8 = vector.broadcast %4 : vector<1x128xf32> to vector<8x128xf32>
    %9 = arith.mulf %7, %8 : vector<8x128xf32>
    %10 = vector.broadcast %3 : vector<8x1xf32> to vector<8x128xf32>
    %11 = vector.broadcast %5 : vector<1x128xf32> to vector<8x128xf32>
    %12 = arith.mulf %10, %11 : vector<8x128xf32>
    %13 = arith.addf %9, %12 : vector<8x128xf32>
    %14 = vector.broadcast %6 : vector<1x128xf32> to vector<8x128xf32>
    %15 = arith.addf %13, %14 : vector<8x128xf32>
    %16 = math.sin %15 : vector<8x128xf32>
    %c0_3 = arith.constant 0 : index
    %c0_4 = arith.constant 0 : index
    %17 = vector.load %arg1[%c0_3, %c0_4] : memref<8x128xf32, #tpu.memory_space<vmem>>, vector<8x128xf32>
    %18 = arith.addf %17, %16 : vector<8x128xf32>
    %c0_5 = arith.constant 0 : index
    %c0_6 = arith.constant 0 : index
    %19 = vector.load %arg4[%c0_5, %c0_6] : memref<8x128xf32, #tpu.memory_space<vmem>>, vector<8x128xf32>
    tpu.vector_store %arg4[%c0_5, %c0_6], %18 {strides = array<i32>} : memref<8x128xf32, #tpu.memory_space<vmem>>, vector<8x128xf32>,
    return
  }
  func.func @transform_0(%arg0: i32) -> (i32, i32) {
    %c0_i32 = arith.constant 0 : i32
    %c0_i32_0 = arith.constant 0 : i32
    return %arg0, %c0_i32 : i32, i32
  }
  func.func @transform_1(%arg0: i32) -> (i32, i32) {
    %c0_i32 = arith.constant 0 : i32
    %c0_i32_0 = arith.constant 0 : i32
    return %arg0, %c0_i32 : i32, i32
  }
  func.func @transform_2(%arg0: i32) -> (i32, i32) {
    %c0_i32 = arith.constant 0 : i32
    %c0_i32_0 = arith.constant 0 : i32
    %c0_i32_1 = arith.constant 0 : i32
    return %c0_i32, %c0_i32_0 : i32, i32
  }
  func.func @transform_3(%arg0: i32) -> (i32, i32) {
    %c0_i32 = arith.constant 0 : i32
    %c0_i32_0 = arith.constant 0 : i32
    return %arg0, %c0_i32 : i32, i32
  }
}

</mosaic_0001>

<bundles_post_ra>
// kernel: tpu_custom_call.1
= control target key start
LH: loop header
LB: loop body
LE: loop exit
PB: predicated region body
PF: predicated region fallthrough
CT: control target
= control target key end

     0   :  { %8 = vsyncpa [#allocation3], 0  ;;  %s837_s0 = inlined_call_operand.hbm [shape: f32[32,128], index: 0, kind: input, shape index: {}, may-alias: {0,3}]   ;;  %s838_s1 = inlined_call_operand.vmem [shape: f32[32,2], index: 1, kind: input, shape index: {}]   ;;  %s839_s2 = inlined_call_operand.vmem [shape: f32[3,128], index: 2, kind: input, shape index: {}]   ;;  %s840_s3 = inlined_call_operand.hbm [shape: f32[32,128], index: 3, kind: output, shape index: {}, may-alias: {0,3}]  }
   0x1   :  { %10 = vsyncpa [#allocation3 + $0x1], 0 }
   0x2   :  { %11 = vsyncpa [#allocation4], 0 }
   0x3   :  { %13 = vsyncpa [#allocation4 + $0x1], 0  ;;  %s642_s12 = smov 0   ;;  %s644_s13 = smov 0  }
   0x4   :  { %s646_s14 = smov 0   ;;  %s648_s15 = smov 0  }
   0x5 LB: > { %s663_s16 = sadd.s32 4294967295, %s610_s15   ;;  %s433_s17 = sadd.s32 4294967294, %s610_s15   ;;  %s610_s15 = sphi %s648_s15, %s854_s15   ;;  %s606_s14 = sphi %s646_s14, %s853_s14   ;;  %s602_s13 = sphi %s644_s13, %s852_s13   ;;  %s598_s12 = sphi %s642_s12, %s851_s12  }
   0x6   : > { %s667_s18 = sadd.s32 1, %s610_s15   ;;  %s26_s19 = sadd.s32 1, %s606_s14 }
   0x7   : > { %s23_s20 = ssub.s32 %s610_s15, %s667_s18  ;;  %p33_p0 = scmp.ne.s32.totalorder %s606_s14, %s602_s13 }
   0x8   : > { %p24_p1 = scmp.eq.s32.totalorder %s23_s20, 0  ;;  %p34_p2 = scmp.eq.s32.totalorder %s610_s15, 0 }
   0x9   : > { %p39_p3 = scmp.ne.s32.totalorder %s602_s13, %s598_s12  ;;  %p40_p4 = scmp.eq.s32.totalorder %s663_s16, 0 }
   0xa   : > { %s679_s21 = scalar_select %p24_p1, %s606_s14, %s26_s19  }
   0xb   : > { %p681_p5 = por %p34_p2, %p33_p0  ;;  %p685_p6 = por %p40_p4, %p39_p3 }
   0xc   : > { %p110_p7 = scmp.eq.s32.totalorder %s663_s16, 3  ;;  %p116_p8 = scmp.eq.s32.totalorder %s433_s17, 3 }
   0xd   : > { %p466_p9 = scmp.lt.s32.totalorder %s610_s15, 4  ;;  %s139_s26 = sand.u32 1, %s606_s14  }
   0xe   : > { %p691_p10 = por %p110_p7, %p33_p0  ;;  %p695_p11 = por %p116_p8, %p39_p3 }
   0xf   : > { %s437_s27 = sshll.u32 %s610_s15, 7  ;;  %s436_s28 = sshll.u32 %s139_s26, 3 }
  0x10   : > { %s844_s24 = scalar_select %p691_p10, 1, 0 }
  0x11   : > { %s845_s25 = scalar_select %p695_p11, 1, 0 }
  0x12   : > { %s704_s4 = scalar_lea.hbm %s837_s0, %s437_s27  ;;  %s143_s5 = scalar_lea.vmem [#allocation2], %s436_s28 }
  0x13   : > { %s150_s6 = sshll.u32 %s143_s5, 4  ;;  %p708_p12 = pnand %p466_p9, %p681_p5  ;;  %s712_s6 = int_to_ptr.vmem [resolvable:$true] %s150_s6 }
  0x14   : > { %s140_s8 = scalar_lea.sflag [#allocation3], %s139_s26  ;;  %s514_s9 = scalar_lea.hbm %s704_s4, 128 }
  0x15   : > { %p515_p1 = scmp.ne.s32.totalorder %s704_s4, %s514_s9  ;;  %p516_p2 = pneg %p708_p12 }
  0x16   : > { %s519_s17 = scalar_lea.hbm %s837_s0, 512  ;;  %p520_p5 = scmp.lt.u32.totalorder %s704_s4, %s837_s0 }
  0x17   : > { %p517_p3 = pnand %p516_p2, %p515_p1  ;;  %p521_p7 = scmp.lt.u32.totalorder %s519_s17, %s514_s9 }
  0x18   : > { %p523_p9 = scmp.lt.u32.totalorder %s514_s9, %s704_s4 }
  0x19   : > { %p518_p4 = pneg %p517_p3  ;;  %p522_p8 = por %p521_p7, %p520_p5 }
  0x1b   : > { %p524_p13 = por %p523_p9, %p522_p8 }
  0x1d   : > { %p525_p0 = pnand %p524_p13, %p518_p4 }
  0x1f   : > { %528 = shalt.err (!%p525_p0)
}
  0x20   : > { %s529_s22 = scalar_lea.vmem %s712_s6, 128  ;;  %s612_s26 = smov [#allocation2]  }
  0x21   : > { %p530_p1 = scmp.ne.s32.totalorder %s712_s6, %s529_s22  ;;  %s534_s27 = sshll.u32 %s612_s26, 4  ;;  %s535_s27 = int_to_ptr.vmem [resolvable:$false] %s534_s27 }
  0x22   : > { %s536_s28 = scalar_lea.vmem %s535_s27, 256  ;;  %p537_p10 = scmp.lt.s32.totalorder %s712_s6, %s535_s27 }
  0x23   : > { %p532_p3 = pnand %p530_p1, %p516_p2  ;;  %p538_p5 = scmp.lt.s32.totalorder %s536_s28, %s529_s22 }
  0x25   : > { %p533_p11 = pneg %p532_p3  ;;  %p539_p7 = por %p538_p5, %p537_p10 }
  0x27   : > { %p540_p8 = pnand %p539_p7, %p533_p11 }
  0x29   : > { %543 = shalt.err (!%p540_p8)
}
  0x2a   : > { %461 = dma.hbm_to_vmem [thread:$0]  (!%p708_p12), %s704_s4, 128, %s712_s6, %s140_s8  }
  0x2b   : > { %p847_p13 = scmp.lt.s32.totalorder %s610_s15, 5  ;;  %p848_p0 = scmp.ge.s32.totalorder %s610_s15, 1 }
  0x2d   : > { %p163_p2 = pnand %p848_p0, %p847_p13 }
  0x2e   : > { %s746_s29 = sand.u32 (!%p163_p2), 1, %s602_s13  }
  0x2f   : > { %166 = sbr.rel (%p163_p2) target bundleno = 296 (0x128), region = 32  ;;  %s439_s30 = sshll.u32 (!%p163_p2), %s746_s29, 3 }
  0x30   : > { %s169_s5 = scalar_lea.sflag (!%p163_p2), [#allocation3], %s746_s29  ;;  %s752_s7 = scalar_lea.vmem (!%p163_p2), [#allocation2], %s439_s30 }
  0x36   : > { %589 = dma.done.wait (%p685_p6), %s169_s5, 128  }
  0x37   : > { %591 = vsyncadd (%p685_p6), %s169_s5, 4294967168  ;;  %p199_p10 = scmp.lt.s32.totalorder %s663_s16, 3  ;;  %v613_v0 = vmov 0   ;;  %v614_v2 = vmov 1   ;;  %v210_v3 = vlaneseq  ;;  %v204_v7 = vld [vmem:[%s839_s2] sm:$0x7] }
  0x38   : > { %508 = vset.pattern.permute.xlu0 %v613_v0  ;;  %v615_v28 = vmov 683565275   ;;  %v616_v30 = vmov 2475754826   ;;  %v617_v33 = vmov 2131351028  }
  0x39   : > { %s200_s4 = scalar_select %p199_p10, %s663_s16, 3  ;;  %v211_v4 = vshrl.u32 %v210_v3, 7  ;;  %v618_v36 = vmov 2102212464   ;;  %v619_v39 = vmov 920167782  }
  0x3a   : > { %v620_v42 = vmov 1326507024   ;;  %s447_s17 = sshll.u32 %s663_s16, 7  ;;  %s198_s19 = scalar_lea.vmem [#allocation5], %s439_s30 }
  0x3b   : > { %s441_s6 = sshll.u32 %s200_s4, 3  ;;  %v212_v5 = vsub.s32 0, %v211_v4  ;;  %v221_v6 = vsub.s32 1, %v211_v4  ;;  %v227_v11 = vsub.s32 2, %v211_v4  ;;  %s351_s20 = sshll.u32 %s198_s19, 4  ;;  %s796_s20 = int_to_ptr.vmem [resolvable:$true] %s351_s20 }
  0x3c   : > { %s202_s10 = scalar_lea.vmem %s838_s1, %s441_s6  ;;  %s794_s27 = scalar_lea.hbm %s840_s3, %s447_s17 }
  0x3d   : > { %v203_v1 = vld [vmem:[%s202_s10] sm:$0xff]  ;;  %v213_v9 = vrot.slane %v204_v7, %v212_v5  ;;  %v222_v10 = vrot.slane %v204_v7, %v221_v6  ;;  %v228_v14 = vrot.slane %v204_v7, %v227_v11  ;;  %s338_s16 = scalar_lea.sflag [#allocation4], %s746_s29  ;;  %s544_s28 = scalar_lea.vmem %s796_s20, 128 }
  0x3e   : > { %207 = vperm.xlu0 %508, %v203_v1   ;;  %p545_p6 = scmp.ne.s32.totalorder %s796_s20, %s544_s28  ;;  %p849_p11 = scmp.ne.s32.totalorder %s844_s24, 0 }
  0x3f   : > { %s621_s30 = smov [#allocation5]  }
  0x40   : > { %p546_p12 = pnand %p545_p6, %p849_p11  ;;  %s548_s5 = sshll.u32 %s621_s30, 4  ;;  %s549_s5 = int_to_ptr.vmem [resolvable:$false] %s548_s5 }
  0x41   : > { %p551_p9 = scmp.lt.s32.totalorder %s796_s20, %s549_s5 }
  0x42   : > { %509 = vset.pattern.permute.xlu0 %v614_v2  ;;  %p547_p4 = pneg %p546_p12 }
  0x43   : > { %216 = vperm.xlu0 %509, %v203_v1  }
  0xbd   : > { %v208_v8 = vpop.permute.xlu0 %207 }
  0xbe   : > { %v214_v13 = vmul.f32 %v213_v9, %v208_v8 }
  0xc2   : > { %v217_v12 = vpop.permute.xlu0 %216 }
  0xc3   : > { %v223_v15 = vmul.f32 %v222_v10, %v217_v12 }
  0xc5   : > { %v224_v16 = vadd.f32 %v223_v15, %v214_v13 }
  0xc7   : > { %v766_v17 = vadd.f32 %v228_v14, %v224_v16 }
  0xc9   : > { %v233_v18 = vand.u32 2139095040, %v766_v17  ;;  %v230_v22 = vand.u32 2147483647, %v766_v17  ;;  %vm232_vm7 = vcmp.lt.s32.totalorder %v766_v17, 0  ;;  %vm322_vm12 = vweird.f32 %v766_v17 }
  0xcb   : > { %v234_v19 = vshrl.u32 %v233_v18, 23  ;;  %v237_v25 = vand.u32 8388607, %v230_v22  ;;  %vm231_vm8 = vcmp.le.f32.partialorder %v230_v22, 0.7853982 }
  0xcd   : > { %v442_v20 = vadd.s32 4294967169, %v234_v19  ;;  %v238_v44 = vor.u32 8388608, %v237_v25 }
  0xcf   : > { %v240_v21 = vadd.s32 1, %v442_v20  ;;  %v278_v58 = vshll.u32 %v238_v44, 8  ;;  %v334_v44 = vld [vmem:[%s752_s7] sm:$0xff]  ;;  %s550_s7 = scalar_lea.vmem %s549_s5, 256 }
  0xd0   : > { %p552_p1 = scmp.lt.s32.totalorder %s550_s7, %s544_s28 }
  0xd1   : > { %vm241_vm0 = vcmp.gt.s32.totalorder %v240_v21, 0 }
  0xd2   : > { %v242_v23 = vsel %vm241_vm0, %v240_v21, 0  ;;  %p553_p3 = por %p552_p1, %p551_p9 }
  0xd3   : > { %v244_v24 = vand.u32 31, %v242_v23  ;;  %v243_v27 = vshrl.u32 %v242_v23, 5 }
  0xd4   : > { %p554_p5 = pnand %p553_p3, %p547_p4 }
  0xd5   : > { %v245_v26 = vsub.s32 32, %v244_v24  ;;  %v247_v29 = vshll.u32 %v615_v28, %v244_v24  ;;  %v250_v31 = vshll.u32 %v616_v30, %v244_v24  ;;  %v253_v35 = vshll.u32 %v617_v33, %v244_v24 }
  0xd6   : > { %v256_v38 = vshll.u32 %v618_v36, %v244_v24  ;;  %v259_v41 = vshll.u32 %v619_v39, %v244_v24  ;;  %vm262_vm1 = vcmp.lt.s32.totalorder %v243_v27, 1  ;;  %vm265_vm2 = vcmp.lt.s32.totalorder %v243_v27, 4 }
  0xd7   : > { %v248_v32 = vshrl.u32 %v616_v30, %v245_v26  ;;  %v251_v34 = vshrl.u32 %v617_v33, %v245_v26  ;;  %v254_v37 = vshrl.u32 %v618_v36, %v245_v26  ;;  %v257_v40 = vshrl.u32 %v619_v39, %v245_v26 }
  0xd8   : > { %v260_v43 = vshrl.u32 %v620_v42, %v245_v26  ;;  %v246_v53 = vshrl.u32 %v615_v28, %v245_v26  ;;  %vm264_vm3 = vcmp.lt.s32.totalorder %v243_v27, 3  ;;  %vm263_vm4 = vcmp.lt.s32.totalorder %v243_v27, 2 }
  0xd9   : > { %v249_v45 = vor.u32 %v248_v32, %v247_v29  ;;  %v252_v46 = vor.u32 %v251_v34, %v250_v31  ;;  %v255_v47 = vor.u32 %v254_v37, %v253_v35  ;;  %v258_v48 = vor.u32 %v257_v40, %v256_v38 }
  0xda   : > { %v261_v49 = vor.u32 %v260_v43, %v259_v41 }
  0xdb   : > { %v267_v50 = vsel %vm265_vm2, %v255_v47, 2102212464  ;;  %v270_v51 = vsel %vm262_vm1, %v249_v45, %v252_v46  ;;  %v274_v52 = vsel %vm262_vm1, %v252_v46, %v255_v47  ;;  %v271_v54 = vsel %vm265_vm2, %v258_v48, 920167782 }
  0xdc   : > { %v275_v55 = vsel %vm265_vm2, %v261_v49, 1326507024  ;;  %v272_v56 = vsel %vm264_vm3, %v255_v47, %v271_v54  ;;  %v266_v59 = vsel %vm262_vm1, %v246_v53, %v249_v45  ;;  %v268_v60 = vsel %vm264_vm3, %v252_v46, %v267_v50 }
  0xdd   : > { %v276_v57 = vsel %vm264_vm3, %v258_v48, %v275_v55  ;;  %v273_v61 = vsel %vm263_vm4, %v270_v51, %v272_v56  ;;  %v269_v3 = vsel %vm263_vm4, %v266_v59, %v268_v60 }
  0xde   : > { %v277_v62 = vsel %vm263_vm4, %v274_v52, %v276_v57  ;;  %v775_v1 = vmul.u32.u64.low %v278_v58, %v273_v61  ;;  %v776_v2 = vmul.u32.u64.high %v278_v58, %v273_v61, %v775_v1  ;;  %v285_v5 = vmul.u32 %v278_v58, %v269_v3 }
  0xdf   : > { %v772_v63 = vmul.u32.u64.low %v278_v58, %v277_v62  ;;  %v773_v0 = vmul.u32.u64.high %v278_v58, %v277_v62, %v772_v63 }
  0xe0   : > { %v288_v4 = vadd.s32 1, %v776_v2 }
  0xe1   : > { %vm287_vm5 = vc.u32 %v773_v0, %v775_v1  ;;  %v286_v18 = vadd.s32 %v775_v1, %v773_v0 }
  0xe2   : > { %v289_v6 = vsel %vm287_vm5, %v288_v4, %v776_v2 }
  0xe3   : > { %v290_v7 = vadd.s32 %v289_v6, %v285_v5 }
  0xe5   : > { %v291_v8 = vadd.s32 536870912, %v290_v7 }
  0xe7   : > { %v292_v9 = vshrl.u32 %v291_v8, 30 }
  0xe9   : > { %v293_v10 = vshll.u32 %v292_v9, 30  ;;  %v316_v31 = vsub.s32 4, %v292_v9 }
  0xeb   : > { %v294_v11 = vsub.s32 %v290_v7, %v293_v10  ;;  %v317_v34 = vsel %vm232_vm7, %v316_v31, %v292_v9 }
  0xec   : > { %v319_v36 = vsel %vm231_vm8, 0, %v317_v34 }
  0xed   : > { %v296_v12 = vsub.s32 0, %v294_v11  ;;  %v323_v37 = vadd.s32 3, %v319_v36 }
  0xef   : > { %v443_v13 = vmin.u32 %v296_v12, %v294_v11  ;;  %v324_v38 = vand.u32 3, %v323_v37 }
  0xf1   : > { %v298_v14 = vclz %v443_v13  ;;  %vm329_vm9 = vcmp.eq.s32.totalorder %v324_v38, 2  ;;  %vm326_vm10 = vcmp.eq.s32.totalorder %v324_v38, 0  ;;  %vm325_vm11 = vcmp.lt.s32.totalorder %v324_v38, 2 }
  0xf3   : > { %v444_v15 = vadd.s32 4294967294, %v298_v14 }
  0xf5   : > { %vm445_vm6 = vcmp.lt.s32.totalorder %v444_v15, 0 }
  0xf6   : > { %v301_v16 = vsel %vm445_vm6, 0, %v444_v15 }
  0xf7   : > { %v302_v19 = vsub.s32 32, %v301_v16  ;;  %v306_v20 = vsub.s32 4294967266, %v301_v16  ;;  %v303_v21 = vshll.u32 %v294_v11, %v301_v16 }
  0xf9   : > { %v304_v23 = vshrl.u32 %v286_v18, %v302_v19  ;;  %v307_v24 = vadd.s32 127, %v306_v20 }
  0xfb   : > { %v305_v25 = vor.u32 %v304_v23, %v303_v21  ;;  %v308_v26 = vshll.u32 %v307_v24, 23 }
  0xfd   : > { %v309_v27 = vor.u32 4788187, %v308_v26  ;;  %v312_v29 = vcvt.s32.f32 %v305_v25 }
  0xff   : > { %v310_v28 = vand.u32 2147483647, %v309_v27 }
 0x101   : > { %v313_v30 = vmul.f32 %v312_v29, %v310_v28 }
 0x103   : > { %v314_v32 = vxor.u32 2147483648, %v313_v30 }
 0x105   : > { %v315_v33 = vsel %vm232_vm7, %v314_v32, %v313_v30 }
 0x106   : > { %v318_v35 = vsel %vm231_vm8, %v766_v17, %v315_v33 }
 0x107   : > { %510 = vcosq.f32 %v318_v35 }
 0x108   : > { %512 = vsinq.f32 %v318_v35 }
 0x111   : > { %v511_v39 = vpop.eup %510 }
 0x112   : > { %v513_v40 = vpop.eup %512  ;;  %v330_v41 = vxor.u32 2147483648, %v511_v39 }
 0x113   : > { %v327_v42 = vxor.u32 2147483648, %v513_v40 }
 0x114   : > { %v331_v22 = vsel %vm329_vm9, %v330_v41, %v513_v40 }
 0x115   : > { %v328_v43 = vsel %vm326_vm10, %v511_v39, %v327_v42 }
 0x116   : > { %v332_v45 = vsel %vm325_vm11, %v328_v43, %v331_v22 }
 0x117   : > { %v333_v46 = vsel %vm322_vm12, nan, %v332_v45 }
 0x118   : > { %v335_v47 = vadd.f32 %v334_v44, %v333_v46 }
 0x11a   : > { %336 = vst [vmem:[%s198_s19] sm:$0xff] %v335_v47 }
 0x11b   : > { %557 = shalt.err (!%p554_p5)
}
 0x11c   : > { %s558_s29 = scalar_lea.hbm %s794_s27, 128  ;;  %s562_s8 = scalar_lea.hbm %s840_s3, 512 }
 0x11d   : > { %p559_p7 = scmp.ne.s32.totalorder %s794_s27, %s558_s29  ;;  %p563_p0 = scmp.lt.u32.totalorder %s794_s27, %s840_s3 }
 0x11e   : > { %p564_p2 = scmp.lt.u32.totalorder %s562_s8, %s558_s29  ;;  %p566_p6 = scmp.lt.u32.totalorder %s558_s29, %s794_s27 }
 0x11f   : > { %p560_p8 = pnand %p559_p7, %p849_p11 }
 0x120   : > { %p565_p10 = por %p564_p2, %p563_p0 }
 0x121   : > { %p561_p13 = pneg %p560_p8 }
 0x122   : > { %p567_p12 = por %p566_p6, %p565_p10 }
 0x124   : > { %p568_p4 = pnand %p567_p12, %p561_p13 }
 0x126   : > { %571 = shalt.err (!%p568_p4)
}
 0x127   : > { %456 = dma.vmem_to_hbm [thread:$0]  (%p849_p11), %s796_s20, 128, %s794_s27, %s338_s16  }
 0x128 PF: > { %p467_p9 = scmp.ge.s32.totalorder %s610_s15, 2  ;;  %s363_s23 = sand.u32 1, %s598_s12  }
 0x129   : > { %p850_p1 = scmp.ne.s32.totalorder %s845_s25, 0  ;;  %s364_s11 = scalar_lea.sflag [#allocation4], %s363_s23 }
 0x12b   : > { %p463_p3 = pnand %p467_p9, %p850_p1 }
 0x12d   : > { %593 = dma.done.wait (!%p463_p3), %s364_s11, 128  }
 0x12e   : > { %595 = vsyncadd (!%p463_p3), %s364_s11, 4294967168  ;;  %p16_p5 = scmp.ge.s32.totalorder %s667_s18, 6   ;;  %s851_s12 = smov %s602_s13 }
 0x12f   : > { %s852_s13 = smov %s606_s14  ;;  %s853_s14 = smov %s679_s21 }
 0x130   : > { %s854_s15 = smov %s667_s18  ;;  %18 = sbr.rel (!%p16_p5) target bundleno = 5 (0x5), region = 80 }
 0x137   :  { %369 = vsyncpa [#allocation3], 1 }
 0x138   :  { %371 = vsyncpa [#allocation3 + $0x1], 1 }
 0x139   :  { %372 = vsyncpa [#allocation4], 1 }
 0x13a   :  { %374 = vsyncpa [#allocation4 + $0x1], 1 }

</bundles_post_ra>
